<compile_context>
chip_gen: v7x
topology: tpu7x:2x2x1
jax: 0.10.0
libtpu: 0.0.40
codegen_flags: <defaults>
</compile_context>

<pallas_src>
import jax
import jax.numpy as jnp
from jax.experimental import pallas as pl
from jax.experimental.pallas import tpu as pltpu


def _round_up(n, m):
    return ((n + m - 1) // m) * m


def _pick_defaults():
    """(tile_b, tile_d, vmem_limit_bytes) tuned per TPU generation."""
    try:
        kind = jax.devices()[0].device_kind.lower()
    except Exception:
        kind = ""
    if "v7" in kind or "7x" in kind:
        # ~3.2 TB/s per TC: amortize the ~0.35us per-grid-step overhead with big
        # tiles; 32 MiB of double-buffered x still fits v7x's 64 MiB VMEM.
        return 1024, 4096, 48 << 20
    if "v6" in kind:
        return 1024, 2048, 40 << 20
    # v5e / unknown: stay under the 16 MiB default scoped VMEM (8 MiB x buffers).
    return 512, 2048, None


def _make_logreg_kernel(d_total, td, need_mask):
    def kernel(x_ref, w_ref, b_ref, o_ref, acc_ref):
        # x_ref: (tb, td) VMEM, w_ref: (1, td) VMEM, b_ref: (1,) SMEM,
        # o_ref: (1, tb) VMEM lane-dense output row, acc_ref: (tb, 1) f32 VMEM.
        k = pl.program_id(1)
        num_k = pl.num_programs(1)

        @pl.when(k == 0)
        def _init():
            acc_ref[...] = jnp.zeros_like(acc_ref)

        def accumulate(x_tile):
            # (tb, td) . (1, td) -> (tb, 1) on the otherwise-idle MXU, f32 acc.
            acc_ref[...] += jax.lax.dot_general(
                x_tile, w_ref[...],
                dimension_numbers=(((1,), (1,)), ((), ())),
                preferred_element_type=jnp.float32)

        if need_mask:
            # Only the last feature tile can read past D: zero those columns so
            # stale-VMEM garbage (possibly NaN/Inf) never reaches the accumulator.
            # All earlier steps stay pure vld + matmul.
            @pl.when(k != num_k - 1)
            def _full():
                accumulate(x_ref[...])

            @pl.when(k == num_k - 1)
            def _tail():
                col = jax.lax.broadcasted_iota(jnp.int32, x_ref.shape, 1) + k * td
                accumulate(jnp.where(col < d_total, x_ref[...], 0.0))
        else:
            accumulate(x_ref[...])

        @pl.when(k == num_k - 1)
        def _finish():
            z = acc_ref[...] + b_ref[0]            # (tb, 1) f32
            y = 1.0 / (1.0 + jnp.exp(-z))          # exact sigmoid (hidden under DMA)
            # Single sublane->lane relayout per batch tile -> lane-dense (1, tb) store.
            o_ref[...] = y[:, 0][None, :].astype(o_ref.dtype)

    return kernel


def logistic_regression_forward(x, w, b, *, tile_b=None, tile_d=None,
                                vmem_limit_bytes=None):
    """x: (B, D), w: (1, D), b: (1,)  ->  (B, 1) = sigmoid(x @ w.T + b)."""
    B, D = x.shape
    out_dtype = x.dtype

    d_tb, d_td, d_vmem = _pick_defaults()
    tile_b = d_tb if tile_b is None else tile_b
    tile_d = d_td if tile_d is None else tile_d
    vmem_limit_bytes = d_vmem if vmem_limit_bytes is None else vmem_limit_bytes

    # Feature tile: multiple of 128 (block-shape constraint); ragged tail is masked
    # in-kernel, so x is never padded / copied in HBM.
    td = min(max(128, _round_up(tile_d, 128)), _round_up(D, 128))
    grid_k = pl.cdiv(D, td)
    need_mask = (D % td) != 0

    # Batch tile: when the batch needs tiling keep it a multiple of 128 (lane-dense
    # output store) and aim for >=2 tiles so v7x's two TensorCores both get work
    # ("parallel" axis). Ragged batch-tail rows produce garbage that is sliced off
    # below (rows are independent, so there is no contamination).
    tb = min(max(128, _round_up(tile_b, 128)), _round_up(pl.cdiv(B, 2), 128))
    if tb >= B:
        tb = _round_up(B, 8)                     # whole batch fits in one tile
    grid_b = pl.cdiv(B, tb)
    b_out = grid_b * tb                           # tiny padded output row

    # Zero-pad only the tiny weight row so its tail tile is exactly 0, never garbage.
    d_pad = grid_k * td
    if d_pad != D:
        w = jnp.pad(w, ((0, 0), (0, d_pad - D)))

    kernel = _make_logreg_kernel(D, td, need_mask)

    cp = dict(dimension_semantics=("parallel", "arbitrary"))
    if vmem_limit_bytes is not None:
        cp["vmem_limit_bytes"] = int(vmem_limit_bytes)

    out = pl.pallas_call(
        kernel,
        out_shape=jax.ShapeDtypeStruct((1, b_out), out_dtype),
        grid_spec=pltpu.PrefetchScalarGridSpec(
            num_scalar_prefetch=0,
            grid=(grid_b, grid_k),
            in_specs=[
                pl.BlockSpec((tb, td), lambda i, k: (i, k)),          # x tile (HBM stream)
                pl.BlockSpec((1, td), lambda i, k: (0, k)),           # weight row chunk
                pl.BlockSpec(memory_space=pltpu.MemorySpace.SMEM),    # bias scalar
            ],
            out_specs=pl.BlockSpec((1, tb), lambda i, k: (0, i)),     # lane-dense row
            scratch_shapes=[pltpu.VMEM((tb, 1), jnp.float32)],        # per-row partials
        ),
        compiler_params=pltpu.CompilerParams(**cp),
    )(x, w, b)

    # Back to the module's (B, 1) layout (cheap host-side reshape + un-pad of a tiny row).
    return out.reshape(b_out, 1)[:B]


if __name__ == "__main__":
    key = jax.random.PRNGKey(0)

    def ref(x, w, b):
        return jax.nn.sigmoid(x @ w.T + b)

    def make_inputs(k, B, D):
        kx, kw, kb = jax.random.split(k, 3)
        x = jax.random.normal(kx, (B, D), dtype=jnp.float32)
        bound = 1.0 / jnp.sqrt(jnp.float32(D))   # nn.Linear default init range
        w = jax.random.uniform(kw, (1, D), dtype=jnp.float32, minval=-bound, maxval=bound)
        b = jax.random.uniform(kb, (1,), dtype=jnp.float32, minval=-bound, maxval=bound)
        return x, w, b

    # Small deterministic example consistent with the module: batch=8, input_size=32.
    # (Exercises the masked tail feature tile: D=32 < 128-lane block.)
    k1, k2 = jax.random.split(key)
    x, w, b = make_inputs(k1, 8, 32)
    y = jax.block_until_ready(logistic_regression_forward(x, w, b))
    assert y.shape == (8, 1)
    # Sigmoid is exact now; tolerance only covers MXU f32 matmul rounding vs XLA ref.
    assert jnp.allclose(y, ref(x, w, b), atol=1e-3, rtol=1e-3), "mismatch vs reference"

    # Exercise the multi-tile path: 2 batch tiles, 3 feature steps, ragged B and D,
    # no padding of x anywhere.
    x2, w2, b2 = make_inputs(k2, 250, 300)
    y2 = jax.block_until_ready(
        logistic_regression_forward(x2, w2, b2, tile_b=128, tile_d=128))
    assert y2.shape == (250, 1)
    assert jnp.allclose(y2, ref(x2, w2, b2), atol=1e-3, rtol=1e-3), "mismatch (tiled path)"

    print("KERNEL_OK")
</pallas_src>

<mosaic_0001>
module attributes {stable_mosaic.version = 11 : i64} {
  func.func @kernel(%arg0: i32, %arg1: i32, %arg2: memref<8x128xf32, #tpu.memory_space<vmem>>, %arg3: memref<1x128xf32, #tpu.memory_space<vmem>>, %arg4: memref<1xf32, #tpu.memory_space<smem>>, %arg5: memref<1x8xf32, #tpu.memory_space<vmem>>, %arg6: memref<8x1xf32, #tpu.memory_space<vmem>>) attributes {dimension_semantics = [#tpu.dimension_semantics<parallel>, #tpu.dimension_semantics<arbitrary>], iteration_bounds = array<i64: 1, 1>, scalar_prefetch = 0 : i64, scratch_operands = 1 : i64, tpu.core_type = #tpu.core_type<tc>, window_params = [{transform_indices = @transform_0, window_bounds = array<i64: 8, 128>}, {transform_indices = @transform_1, window_bounds = array<i64: 1, 128>}, {transform_indices = @transform_2, window_bounds = array<i64: 1>}, {transform_indices = @transform_3, window_bounds = array<i64: 1, 8>}]} {
    %c0_i32 = arith.constant 0 : i32
    %0 = arith.cmpi eq, %arg1, %c0_i32 : i32
    %1 = arith.extui %0 : i1 to i32
    %c0_i32_0 = arith.constant 0 : i32
    %2 = arith.cmpi ne, %1, %c0_i32_0 : i32
    scf.if %2 {
      %cst = arith.constant 0.000000e+00 : f32
      %12 = vector.broadcast %cst : f32 to vector<8x1xf32>
      %c0 = arith.constant 0 : index
      %c0_7 = arith.constant 0 : index
      %13 = vector.load %arg6[%c0, %c0_7] : memref<8x1xf32, #tpu.memory_space<vmem>>, vector<8x1xf32>
      tpu.vector_store %arg6[%c0, %c0_7], %12 {strides = array<i32>} : memref<8x1xf32, #tpu.memory_space<vmem>>, vector<8x1xf32>,
    } else {
    }
    %c0_i32_1 = arith.constant 0 : i32
    %3 = arith.cmpi ne, %arg1, %c0_i32_1 : i32
    %4 = arith.extui %3 : i1 to i32
    %c0_i32_2 = arith.constant 0 : i32
    %5 = arith.cmpi ne, %4, %c0_i32_2 : i32
    scf.if %5 {
      %c0 = arith.constant 0 : index
      %c0_7 = arith.constant 0 : index
      %12 = vector.load %arg2[%c0, %c0_7] : memref<8x128xf32, #tpu.memory_space<vmem>>, vector<8x128xf32>
      %c0_8 = arith.constant 0 : index
      %c0_9 = arith.constant 0 : index
      %13 = vector.load %arg6[%c0_8, %c0_9] : memref<8x1xf32, #tpu.memory_space<vmem>>, vector<8x1xf32>
      %c0_10 = arith.constant 0 : index
      %c0_11 = arith.constant 0 : index
      %14 = vector.load %arg3[%c0_10, %c0_11] : memref<1x128xf32, #tpu.memory_space<vmem>>, vector<1x128xf32>
      %cst = arith.constant dense<0.000000e+00> : vector<8x1xf32>
      %15 = tpu.matmul %12, %14, %cst {dimension_numbers = #tpu.dot_dimension_numbers<[1], [1], [0], [0], [0, 0, 1, 0], [], []>} : vector<8x128xf32>, vector<1x128xf32>, vector<8x1xf32> -> vector<8x1xf32>
      %16 = arith.addf %13, %15 : vector<8x1xf32>
      %c0_12 = arith.constant 0 : index
      %c0_13 = arith.constant 0 : index
      %17 = vector.load %arg6[%c0_12, %c0_13] : memref<8x1xf32, #tpu.memory_space<vmem>>, vector<8x1xf32>
      tpu.vector_store %arg6[%c0_12, %c0_13], %16 {strides = array<i32>} : memref<8x1xf32, #tpu.memory_space<vmem>>, vector<8x1xf32>,
    } else {
    }
    %c0_i32_3 = arith.constant 0 : i32
    %6 = arith.cmpi eq, %arg1, %c0_i32_3 : i32
    %7 = arith.extui %6 : i1 to i32
    %c0_i32_4 = arith.constant 0 : i32
    %8 = arith.cmpi ne, %7, %c0_i32_4 : i32
    scf.if %8 {
      %12 = tpu.iota {dimensions = array<i32: 1>} : vector<8x128xi32>
      %c128_i32 = arith.constant 128 : i32
      %13 = arith.muli %arg1, %c128_i32 : i32
      %14 = vector.broadcast %13 : i32 to vector<8x128xi32>
      %15 = arith.addi %12, %14 : vector<8x128xi32>
      %c32_i32 = arith.constant 32 : i32
      %16 = vector.broadcast %c32_i32 : i32 to vector<8x128xi32>
      %17 = arith.cmpi slt, %15, %16 : vector<8x128xi32>
      %c0 = arith.constant 0 : index
      %c0_7 = arith.constant 0 : index
      %18 = vector.load %arg2[%c0, %c0_7] : memref<8x128xf32, #tpu.memory_space<vmem>>, vector<8x128xf32>
      %cst = arith.constant 0.000000e+00 : f32
      %19 = vector.broadcast %cst : f32 to vector<8x128xf32>
      %20 = arith.select %17, %18, %19 : vector<8x128xi1>, vector<8x128xf32>
      %c0_8 = arith.constant 0 : index
      %c0_9 = arith.constant 0 : index
      %21 = vector.load %arg6[%c0_8, %c0_9] : memref<8x1xf32, #tpu.memory_space<vmem>>, vector<8x1xf32>
      %c0_10 = arith.constant 0 : index
      %c0_11 = arith.constant 0 : index
      %22 = vector.load %arg3[%c0_10, %c0_11] : memref<1x128xf32, #tpu.memory_space<vmem>>, vector<1x128xf32>
      %cst_12 = arith.constant dense<0.000000e+00> : vector<8x1xf32>
      %23 = tpu.matmul %20, %22, %cst_12 {dimension_numbers = #tpu.dot_dimension_numbers<[1], [1], [0], [0], [0, 0, 1, 0], [], []>} : vector<8x128xf32>, vector<1x128xf32>, vector<8x1xf32> -> vector<8x1xf32>
      %24 = arith.addf %21, %23 : vector<8x1xf32>
      %c0_13 = arith.constant 0 : index
      %c0_14 = arith.constant 0 : index
      %25 = vector.load %arg6[%c0_13, %c0_14] : memref<8x1xf32, #tpu.memory_space<vmem>>, vector<8x1xf32>
      tpu.vector_store %arg6[%c0_13, %c0_14], %24 {strides = array<i32>} : memref<8x1xf32, #tpu.memory_space<vmem>>, vector<8x1xf32>,
    } else {
    }
    %c0_i32_5 = arith.constant 0 : i32
    %9 = arith.cmpi eq, %arg1, %c0_i32_5 : i32
    %10 = arith.extui %9 : i1 to i32
    %c0_i32_6 = arith.constant 0 : i32
    %11 = arith.cmpi ne, %10, %c0_i32_6 : i32
    scf.if %11 {
      %c0 = arith.constant 0 : index
      %c0_7 = arith.constant 0 : index
      %12 = vector.load %arg6[%c0, %c0_7] : memref<8x1xf32, #tpu.memory_space<vmem>>, vector<8x1xf32>
      %c0_8 = arith.constant 0 : index
      %13 = memref.load %arg4[%c0_8] : memref<1xf32, #tpu.memory_space<smem>>
      %14 = vector.broadcast %13 : f32 to vector<8x1xf32>
      %15 = arith.addf %12, %14 : vector<8x1xf32>
      %cst = arith.constant 0.000000e+00 : f32
      %16 = vector.broadcast %cst : f32 to vector<8x1xf32>
      %17 = arith.subf %16, %15 : vector<8x1xf32>
      %18 = math.exp %17 : vector<8x1xf32>
      %cst_9 = arith.constant 1.000000e+00 : f32
      %19 = vector.broadcast %cst_9 : f32 to vector<8x1xf32>
      %20 = arith.addf %19, %18 : vector<8x1xf32>
      %cst_10 = arith.constant 1.000000e+00 : f32
      %21 = vector.broadcast %cst_10 : f32 to vector<8x1xf32>
      %22 = arith.divf %21, %20 : vector<8x1xf32>
      %23 = vector.shape_cast %22 : vector<8x1xf32> to vector<8xf32>
      %24 = vector.shape_cast %23 : vector<8xf32> to vector<1x8xf32>
      %c0_11 = arith.constant 0 : index
      %c0_12 = arith.constant 0 : index
      %25 = vector.load %arg5[%c0_11, %c0_12] : memref<1x8xf32, #tpu.memory_space<vmem>>, vector<1x8xf32>
      tpu.vector_store %arg5[%c0_11, %c0_12], %24 {strides = array<i32>} : memref<1x8xf32, #tpu.memory_space<vmem>>, vector<1x8xf32>,
    } else {
    }
    return
  }
  func.func @transform_0(%arg0: i32, %arg1: i32) -> (i32, i32) {
    %c0_i32 = arith.constant 0 : i32
    return %arg0, %arg1 : i32, i32
  }
  func.func @transform_1(%arg0: i32, %arg1: i32) -> (i32, i32) {
    %c0_i32 = arith.constant 0 : i32
    %c0_i32_0 = arith.constant 0 : i32
    return %c0_i32, %arg1 : i32, i32
  }
  func.func @transform_2(%arg0: i32, %arg1: i32) -> i32 {
    %c0_i32 = arith.constant 0 : i32
    %c0_i32_0 = arith.constant 0 : i32
    return %c0_i32 : i32
  }
  func.func @transform_3(%arg0: i32, %arg1: i32) -> (i32, i32) {
    %c0_i32 = arith.constant 0 : i32
    %c0_i32_0 = arith.constant 0 : i32
    return %c0_i32, %arg0 : i32, i32
  }
}

</mosaic_0001>

<bundles_post_ra>
// kernel: tpu_custom_call.1
= control target key start
LH: loop header
LB: loop body
LE: loop exit
PB: predicated region body
PF: predicated region fallthrough
CT: control target
= control target key end

     0   :  { %9 = vsyncpa [#allocation5], 0  ;;  %s229_s0 = inlined_call_operand.hbm [shape: f32[8,32], index: 0, kind: input, shape index: {}]   ;;  %s230_s1 = inlined_call_operand.vmem [shape: f32[1,128], index: 1, kind: input, shape index: {}]   ;;  %s231_s2 = inlined_call_operand.<no memory space> [shape: f32[1], index: 2, kind: input, shape index: {}]   ;;  %s232_s3 = inlined_call_operand.hbm [shape: f32[1,8], index: 3, kind: output, shape index: {}]  }
   0x1   :  { %10 = vsyncpa [#allocation6], 0  ;;  %s173_s12 = smov [#allocation4]   ;;  %s125_s16 = scalar_lea.hbm %s229_s0, 128 }
   0x2   :  { %s17_s13 = sshll.u32 %s173_s12, 4  ;;  %p126_p0 = scmp.ne.s32.totalorder %s229_s0, %s125_s16  ;;  %s18_s13 = int_to_ptr.vmem [resolvable:$true] %s17_s13 }
   0x3   :  { %p129_p1 = scmp.lt.u32.totalorder %s125_s16, %s229_s0 }
   0x5   :  { %p131_p2 = pnand %p129_p1, %p126_p0 }
   0x7   :  { %134 = shalt.err (!%p131_p2)
}
   0x8   :  { %s135_s21 = scalar_lea.vmem %s18_s13, 128  ;;  %p140_p4 = scmp.lt.s32.totalorder %s18_s13, %s18_s13 }
   0x9   :  { %p136_p3 = scmp.ne.s32.totalorder %s18_s13, %s135_s21  ;;  %p141_p5 = scmp.lt.s32.totalorder %s135_s21, %s135_s21 }
   0xb   :  { %p142_p6 = por %p141_p5, %p140_p4 }
   0xd   :  { %p143_p7 = pnand %p142_p6, %p136_p3 }
   0xf   :  { %146 = shalt.err (!%p143_p7)
}
  0x10   :  { %20 = dma.hbm_to_vmem [thread:$0]  %s229_s0, 128, %s18_s13, [#allocation5]  }
  0x11   :  { %169 = dma.done.wait [#allocation5], 128  }
  0x12   :  { %170 = vsyncadd [#allocation5], 4294967168  ;;  %v56_v0 = vlaneseq  ;;  %vm32_vm0 = vcmask 7168   ;;  %v174_v1 = vmov 0.0   ;;  %v62_v3 = vld [vmem:[#allocation4] sm:$0xff]  ;;  %v175_v7 = vmov 0  }
  0x13   :  { %33 = vst.msk [vmem:[#allocation2] sm:$0xff] %vm32_vm0, %v174_v1  ;;  %v115_v4 = vld [vmem:[%s230_s1] ss:$0 sm:$0xff]  ;;  %120 = vset.pattern.permute.xlu0 %v175_v7  ;;  %v80_v13 = vstv %s231_s2  ;;  %s176_s1 = smov [#allocation7]   ;;  %vm97_vm2 = vcmask 57344  }
  0x14   :  { %v57_v2 = vand.u32 127, %v56_v0  ;;  %v93_v8 = vshrl.u32 %v56_v0, 7  ;;  %s105_s27 = sshll.u32 %s176_s1, 4  ;;  %s106_s27 = int_to_ptr.vmem [resolvable:$true] %s105_s27 }
  0x15   :  { %s147_s28 = scalar_lea.vmem %s106_s27, 16  ;;  %s151_s2 = scalar_lea.vmem %s106_s27, 32 }
  0x16   :  { %vm61_vm1 = vcmp.lt.s32.totalorder %v57_v2, 32  ;;  %v94_v9 = vsub.s32 %v57_v2, %v93_v8  ;;  %p148_p8 = scmp.ne.s32.totalorder %s106_s27, %s147_s28  ;;  %p152_p9 = scmp.lt.s32.totalorder %s106_s27, %s106_s27 }
  0x17   :  { %v63_v5 = vsel %vm61_vm1, %v62_v3, 0.0  ;;  %p153_p10 = scmp.lt.s32.totalorder %s151_s2, %s147_s28 }
  0x18   :  { %v72_v6 = vmul.f32 %v115_v4, %v63_v5 }
  0x19   :  { %p154_p11 = por %p153_p10, %p152_p9 }
  0x1a   :  { %73 = vadd.xlane.f32.xlu0 %v72_v6  ;;  %v64_v10 = vld [vmem:[#allocation2] sm:$0xff] }
  0x1b   :  { %p155_p12 = pnand %p154_p11, %p148_p8 }
  0xa7   :  { %v74_v11 = vpop.xlane.xlu0 %73 }
  0xa8   :  { %v75_v12 = vadd.f32 %v74_v11, %v64_v10 }
  0xaa   :  { %77 = vst.msk [vmem:[#allocation2] sm:$0xff] %vm32_vm0, %v75_v12 }
  0xb1   :  { %v78_v14 = vld [vmem:[#allocation2] sm:$0xff] }
  0xb2   :  { %v81_v15 = vadd.f32 %v80_v13, %v78_v14 }
  0xb4   :  { %v82_v16 = vsub.f32 0.0, %v81_v15 }
  0xb6   :  { %v83_v17 = vmul.f32 1.442695, %v82_v16 }
  0xb8   :  { %121 = vpow2.f32 %v83_v17 }
  0xc2   :  { %v122_v18 = vpop.eup %121 }
  0xc3   :  { %v85_v19 = vadd.f32 1.0, %v122_v18 }
  0xc5   :  { %123 = vrcp.f32 %v85_v19 }
  0xcf   :  { %v124_v20 = vpop.eup %123 }
  0xd0   :  { %90 = vperm.xlu0 %120, %v124_v20  }
 0x14f   :  { %v91_v21 = vpop.permute.xlu0 %90 }
 0x150   :  { %v95_v22 = vrot.slane %v91_v21, %v94_v9 }
 0x152   :  { %98 = vst.msk [vmem:[#allocation7] sm:$0x1] %vm97_vm2, %v95_v22 }
 0x153   :  { %158 = shalt.err (!%p155_p12)
}
 0x154   :  { %s159_s4 = scalar_lea.hbm %s232_s3, 16 }
 0x155   :  { %p160_p13 = scmp.ne.s32.totalorder %s232_s3, %s159_s4  ;;  %p163_p0 = scmp.lt.u32.totalorder %s159_s4, %s232_s3 }
 0x157   :  { %p165_p1 = pnand %p163_p0, %p160_p13 }
 0x159   :  { %168 = shalt.err (!%p165_p1)
}
 0x15a   :  { %108 = dma.vmem_to_hbm [thread:$0]  %s106_s27, 16, %s232_s3, [#allocation6]  }
 0x15b   :  { %171 = dma.done.wait [#allocation6], 16  }
 0x15c   :  { %172 = vsyncadd [#allocation6], 4294967280 }
 0x15d   :  { %112 = vsyncpa [#allocation5], 1 }
 0x15e   :  { %113 = vsyncpa [#allocation6], 1 }

</bundles_post_ra>
